<compile_context>
chip_gen: v7x
topology: tpu7x:2x2x1
jax: 0.10.0
libtpu: 0.0.40
codegen_flags: <defaults>
</compile_context>

<pallas_src>
import jax
import jax.numpy as jnp
from jax.experimental import pallas as pl
from jax.experimental.pallas import tpu as pltpu

HIDDEN = 256


def _critic_kernel(s_ref, a_ref,
                   w1s_ref, w1a_ref, b1_ref,
                   w2_ref, b2_ref,
                   w3_ref, b3_ref,
                   w4_ref, b4_ref,
                   q_ref):
    """Fused MLP tile: relu(relu(relu([s|a]@W1+b1)@W2+b2)@W3+b3)@W4+b4.

    Matmul operands are bf16 (MXU-native on v6e/v7x), accumulation is f32,
    and all elementwise work (bias add, ReLU) happens on the f32 accumulator.
    """
    s = s_ref[...].astype(jnp.bfloat16)
    a = a_ref[...].astype(jnp.bfloat16)

    h = (jnp.dot(s, w1s_ref[...], preferred_element_type=jnp.float32)
         + jnp.dot(a, w1a_ref[...], preferred_element_type=jnp.float32)
         + b1_ref[...])
    h = jnp.maximum(h, 0.0)

    h = jnp.dot(h.astype(jnp.bfloat16), w2_ref[...],
                preferred_element_type=jnp.float32) + b2_ref[...]
    h = jnp.maximum(h, 0.0)

    h = jnp.dot(h.astype(jnp.bfloat16), w3_ref[...],
                preferred_element_type=jnp.float32) + b3_ref[...]
    h = jnp.maximum(h, 0.0)

    q = jnp.dot(h.astype(jnp.bfloat16), w4_ref[...],
                preferred_element_type=jnp.float32) + b4_ref[...]
    q_ref[...] = q.astype(q_ref.dtype)


def critic_forward(state, continuous_action, params, *, block_b=256):
    """JAX wrapper: batch-tiled fused Pallas MLP kernel (no concat needed)."""
    w1s, w1a, b1, w2, b2, w3, b3, w4, b4 = params

    B, state_dim = state.shape
    act_dim = continuous_action.shape[1]
    out_dim = w4.shape[1]

    # Batch tile: multiple of 8 sublanes, capped at block_b. Pad B up to a
    # multiple of the tile so every block is full (padded rows are discarded).
    tb = min(block_b, max(8, ((B + 7) // 8) * 8))
    b_pad = ((B + tb - 1) // tb) * tb
    if b_pad != B:
        pad = b_pad - B
        state = jnp.pad(state, ((0, pad), (0, 0)))
        continuous_action = jnp.pad(continuous_action, ((0, pad), (0, 0)))

    grid = (b_pad // tb,)

    def batch_spec(feat):
        # Tile along batch; feature dim is the full array extent.
        return pl.BlockSpec((tb, feat), lambda i: (i, 0))

    def resident_spec(shape):
        # Whole-array block, same block for every grid step -> stays in VMEM.
        return pl.BlockSpec(shape, lambda i: (0,) * len(shape))

    q = pl.pallas_call(
        _critic_kernel,
        out_shape=jax.ShapeDtypeStruct((b_pad, out_dim), jnp.float32),
        grid=grid,
        in_specs=[
            batch_spec(state_dim),
            batch_spec(act_dim),
            resident_spec(w1s.shape), resident_spec(w1a.shape), resident_spec(b1.shape),
            resident_spec(w2.shape), resident_spec(b2.shape),
            resident_spec(w3.shape), resident_spec(b3.shape),
            resident_spec(w4.shape), resident_spec(b4.shape),
        ],
        out_specs=batch_spec(out_dim),
        compiler_params=pltpu.CompilerParams(
            dimension_semantics=("parallel",),
        ),
    )(state, continuous_action, w1s, w1a, b1, w2, b2, w3, b3, w4, b4)

    return q[:B] if b_pad != B else q


def init_critic_params(key, state_dim, continuous_action_dim, discrete_action_dim):
    """Deterministic init mirroring nn.Linear default (uniform +-1/sqrt(fan_in)).

    Weights are stored transposed relative to PyTorch, shape (in, out), and in
    bf16 (MXU operand dtype). The first layer's weight is split along its
    input dim into a state part and an action part (equivalent to concat).
    Biases are (1, out) f32 for TPU-friendly 2-D broadcasting.
    """
    in1 = state_dim + continuous_action_dim
    dims = [(in1, HIDDEN), (HIDDEN, HIDDEN), (HIDDEN, HIDDEN), (HIDDEN, discrete_action_dim)]

    raw = []
    for (fan_in, fan_out) in dims:
        key, kw, kb = jax.random.split(key, 3)
        bound = 1.0 / (fan_in ** 0.5)
        w = jax.random.uniform(kw, (fan_in, fan_out), jnp.float32, -bound, bound)
        b = jax.random.uniform(kb, (1, fan_out), jnp.float32, -bound, bound)
        raw.append((w, b))

    (w1, b1), (w2, b2), (w3, b3), (w4, b4) = raw
    w1s = w1[:state_dim].astype(jnp.bfloat16)
    w1a = w1[state_dim:].astype(jnp.bfloat16)
    return (w1s, w1a, b1,
            w2.astype(jnp.bfloat16), b2,
            w3.astype(jnp.bfloat16), b3,
            w4.astype(jnp.bfloat16), b4)


def critic_reference(state, continuous_action, params):
    """Pure-JAX f32 reference for correctness checking (weights upcast)."""
    w1s, w1a, b1, w2, b2, w3, b3, w4, b4 = params
    f32 = lambda t: t.astype(jnp.float32)
    h = jnp.maximum(state @ f32(w1s) + continuous_action @ f32(w1a) + b1, 0.0)
    h = jnp.maximum(h @ f32(w2) + b2, 0.0)
    h = jnp.maximum(h @ f32(w3) + b3, 0.0)
    return h @ f32(w4) + b4


if __name__ == "__main__":
    state_dim = 16
    continuous_action_dim = 8
    discrete_action_dim = 4

    key = jax.random.PRNGKey(0)
    key, kp = jax.random.split(key)
    params = init_critic_params(kp, state_dim, continuous_action_dim, discrete_action_dim)

    # --- small-batch case (B=2, single 8-row tile) -----------------------
    key, ks, ka = jax.random.split(key, 3)
    state = jax.random.normal(ks, (2, state_dim), jnp.float32)
    action = jax.random.normal(ka, (2, continuous_action_dim), jnp.float32)

    q = critic_forward(state, action, params)
    q = jax.block_until_ready(q)
    q_ref = critic_reference(state, action, params)
    assert q.shape == (2, discrete_action_dim)
    assert jnp.allclose(q, q_ref, atol=2e-2, rtol=2e-2), "mismatch vs reference (B=2)"

    # --- multi-tile case (exercises the batch grid + padding path) -------
    key, ks, ka = jax.random.split(key, 3)
    state_big = jax.random.normal(ks, (300, state_dim), jnp.float32)
    action_big = jax.random.normal(ka, (300, continuous_action_dim), jnp.float32)

    q_big = jax.block_until_ready(critic_forward(state_big, action_big, params))
    q_big_ref = critic_reference(state_big, action_big, params)
    assert q_big.shape == (300, discrete_action_dim)
    assert jnp.allclose(q_big, q_big_ref, atol=2e-2, rtol=2e-2), "mismatch vs reference (B=300)"

    print("KERNEL_OK")
</pallas_src>

<mosaic_0001>
module attributes {stable_mosaic.version = 11 : i64} {
  func.func @_critic_kernel(%arg0: i32, %arg1: memref<8x16xf32, #tpu.memory_space<vmem>>, %arg2: memref<8x8xf32, #tpu.memory_space<vmem>>, %arg3: memref<16x256xbf16, #tpu.memory_space<vmem>>, %arg4: memref<8x256xbf16, #tpu.memory_space<vmem>>, %arg5: memref<1x256xf32, #tpu.memory_space<vmem>>, %arg6: memref<256x256xbf16, #tpu.memory_space<vmem>>, %arg7: memref<1x256xf32, #tpu.memory_space<vmem>>, %arg8: memref<256x256xbf16, #tpu.memory_space<vmem>>, %arg9: memref<1x256xf32, #tpu.memory_space<vmem>>, %arg10: memref<256x4xbf16, #tpu.memory_space<vmem>>, %arg11: memref<1x4xf32, #tpu.memory_space<vmem>>, %arg12: memref<8x4xf32, #tpu.memory_space<vmem>>) attributes {dimension_semantics = [#tpu.dimension_semantics<parallel>], iteration_bounds = array<i64: 1>, scalar_prefetch = 0 : i64, scratch_operands = 0 : i64, tpu.core_type = #tpu.core_type<tc>, window_params = [{transform_indices = @transform_0, window_bounds = array<i64: 8, 16>}, {transform_indices = @transform_1, window_bounds = array<i64: 8, 8>}, {pipeline_mode = #tpu.pipeline_mode<synchronous>, transform_indices = @transform_2, window_bounds = array<i64: 16, 256>}, {pipeline_mode = #tpu.pipeline_mode<synchronous>, transform_indices = @transform_3, window_bounds = array<i64: 8, 256>}, {pipeline_mode = #tpu.pipeline_mode<synchronous>, transform_indices = @transform_4, window_bounds = array<i64: 1, 256>}, {pipeline_mode = #tpu.pipeline_mode<synchronous>, transform_indices = @transform_5, window_bounds = array<i64: 256, 256>}, {pipeline_mode = #tpu.pipeline_mode<synchronous>, transform_indices = @transform_6, window_bounds = array<i64: 1, 256>}, {pipeline_mode = #tpu.pipeline_mode<synchronous>, transform_indices = @transform_7, window_bounds = array<i64: 256, 256>}, {pipeline_mode = #tpu.pipeline_mode<synchronous>, transform_indices = @transform_8, window_bounds = array<i64: 1, 256>}, {pipeline_mode = #tpu.pipeline_mode<synchronous>, transform_indices = @transform_9, window_bounds = array<i64: 256, 4>}, {pipeline_mode = #tpu.pipeline_mode<synchronous>, transform_indices = @transform_10, window_bounds = array<i64: 1, 4>}, {transform_indices = @transform_11, window_bounds = array<i64: 8, 4>}]} {
    %c0 = arith.constant 0 : index
    %c0_0 = arith.constant 0 : index
    %0 = vector.load %arg1[%c0, %c0_0] : memref<8x16xf32, #tpu.memory_space<vmem>>, vector<8x16xf32>
    %1 = arith.truncf %0 : vector<8x16xf32> to vector<8x16xbf16>
    %c0_1 = arith.constant 0 : index
    %c0_2 = arith.constant 0 : index
    %2 = vector.load %arg2[%c0_1, %c0_2] : memref<8x8xf32, #tpu.memory_space<vmem>>, vector<8x8xf32>
    %3 = arith.truncf %2 : vector<8x8xf32> to vector<8x8xbf16>
    %c0_3 = arith.constant 0 : index
    %c0_4 = arith.constant 0 : index
    %4 = vector.load %arg3[%c0_3, %c0_4] : memref<16x256xbf16, #tpu.memory_space<vmem>>, vector<16x256xbf16>
    %cst = arith.constant dense<0.000000e+00> : vector<8x256xf32>
    %5 = tpu.matmul %1, %4, %cst {dimension_numbers = #tpu.dot_dimension_numbers<[1], [0], [0], [1], [0, 0, 1, 1], [], []>} : vector<8x16xbf16>, vector<16x256xbf16>, vector<8x256xf32> -> vector<8x256xf32>
    %c0_5 = arith.constant 0 : index
    %c0_6 = arith.constant 0 : index
    %6 = vector.load %arg4[%c0_5, %c0_6] : memref<8x256xbf16, #tpu.memory_space<vmem>>, vector<8x256xbf16>
    %cst_7 = arith.constant dense<0.000000e+00> : vector<8x256xf32>
    %7 = tpu.matmul %3, %6, %cst_7 {dimension_numbers = #tpu.dot_dimension_numbers<[1], [0], [0], [1], [0, 0, 1, 1], [], []>} : vector<8x8xbf16>, vector<8x256xbf16>, vector<8x256xf32> -> vector<8x256xf32>
    %8 = arith.addf %5, %7 : vector<8x256xf32>
    %c0_8 = arith.constant 0 : index
    %c0_9 = arith.constant 0 : index
    %9 = vector.load %arg5[%c0_8, %c0_9] : memref<1x256xf32, #tpu.memory_space<vmem>>, vector<1x256xf32>
    %10 = vector.broadcast %9 : vector<1x256xf32> to vector<8x256xf32>
    %11 = arith.addf %8, %10 : vector<8x256xf32>
    %cst_10 = arith.constant 0.000000e+00 : f32
    %12 = vector.broadcast %cst_10 : f32 to vector<8x256xf32>
    %13 = arith.maximumf %11, %12 : vector<8x256xf32>
    %14 = arith.truncf %13 : vector<8x256xf32> to vector<8x256xbf16>
    %c0_11 = arith.constant 0 : index
    %c0_12 = arith.constant 0 : index
    %15 = vector.load %arg6[%c0_11, %c0_12] : memref<256x256xbf16, #tpu.memory_space<vmem>>, vector<256x256xbf16>
    %cst_13 = arith.constant dense<0.000000e+00> : vector<8x256xf32>
    %16 = tpu.matmul %14, %15, %cst_13 {dimension_numbers = #tpu.dot_dimension_numbers<[1], [0], [0], [1], [0, 0, 1, 1], [], []>} : vector<8x256xbf16>, vector<256x256xbf16>, vector<8x256xf32> -> vector<8x256xf32>
    %c0_14 = arith.constant 0 : index
    %c0_15 = arith.constant 0 : index
    %17 = vector.load %arg7[%c0_14, %c0_15] : memref<1x256xf32, #tpu.memory_space<vmem>>, vector<1x256xf32>
    %18 = vector.broadcast %17 : vector<1x256xf32> to vector<8x256xf32>
    %19 = arith.addf %16, %18 : vector<8x256xf32>
    %cst_16 = arith.constant 0.000000e+00 : f32
    %20 = vector.broadcast %cst_16 : f32 to vector<8x256xf32>
    %21 = arith.maximumf %19, %20 : vector<8x256xf32>
    %22 = arith.truncf %21 : vector<8x256xf32> to vector<8x256xbf16>
    %c0_17 = arith.constant 0 : index
    %c0_18 = arith.constant 0 : index
    %23 = vector.load %arg8[%c0_17, %c0_18] : memref<256x256xbf16, #tpu.memory_space<vmem>>, vector<256x256xbf16>
    %cst_19 = arith.constant dense<0.000000e+00> : vector<8x256xf32>
    %24 = tpu.matmul %22, %23, %cst_19 {dimension_numbers = #tpu.dot_dimension_numbers<[1], [0], [0], [1], [0, 0, 1, 1], [], []>} : vector<8x256xbf16>, vector<256x256xbf16>, vector<8x256xf32> -> vector<8x256xf32>
    %c0_20 = arith.constant 0 : index
    %c0_21 = arith.constant 0 : index
    %25 = vector.load %arg9[%c0_20, %c0_21] : memref<1x256xf32, #tpu.memory_space<vmem>>, vector<1x256xf32>
    %26 = vector.broadcast %25 : vector<1x256xf32> to vector<8x256xf32>
    %27 = arith.addf %24, %26 : vector<8x256xf32>
    %cst_22 = arith.constant 0.000000e+00 : f32
    %28 = vector.broadcast %cst_22 : f32 to vector<8x256xf32>
    %29 = arith.maximumf %27, %28 : vector<8x256xf32>
    %30 = arith.truncf %29 : vector<8x256xf32> to vector<8x256xbf16>
    %c0_23 = arith.constant 0 : index
    %c0_24 = arith.constant 0 : index
    %31 = vector.load %arg10[%c0_23, %c0_24] : memref<256x4xbf16, #tpu.memory_space<vmem>>, vector<256x4xbf16>
    %cst_25 = arith.constant dense<0.000000e+00> : vector<8x4xf32>
    %32 = tpu.matmul %30, %31, %cst_25 {dimension_numbers = #tpu.dot_dimension_numbers<[1], [0], [0], [1], [0, 0, 1, 1], [], []>} : vector<8x256xbf16>, vector<256x4xbf16>, vector<8x4xf32> -> vector<8x4xf32>
    %c0_26 = arith.constant 0 : index
    %c0_27 = arith.constant 0 : index
    %33 = vector.load %arg11[%c0_26, %c0_27] : memref<1x4xf32, #tpu.memory_space<vmem>>, vector<1x4xf32>
    %34 = vector.broadcast %33 : vector<1x4xf32> to vector<8x4xf32>
    %35 = arith.addf %32, %34 : vector<8x4xf32>
    %c0_28 = arith.constant 0 : index
    %c0_29 = arith.constant 0 : index
    %36 = vector.load %arg12[%c0_28, %c0_29] : memref<8x4xf32, #tpu.memory_space<vmem>>, vector<8x4xf32>
    tpu.vector_store %arg12[%c0_28, %c0_29], %35 {strides = array<i32>} : memref<8x4xf32, #tpu.memory_space<vmem>>, vector<8x4xf32>,
    return
  }
  func.func @transform_0(%arg0: i32) -> (i32, i32) {
    %c0_i32 = arith.constant 0 : i32
    %c0_i32_0 = arith.constant 0 : i32
    return %arg0, %c0_i32 : i32, i32
  }
  func.func @transform_1(%arg0: i32) -> (i32, i32) {
    %c0_i32 = arith.constant 0 : i32
    %c0_i32_0 = arith.constant 0 : i32
    return %arg0, %c0_i32 : i32, i32
  }
  func.func @transform_2(%arg0: i32) -> (i32, i32) {
    %c0_i32 = arith.constant 0 : i32
    %c0_i32_0 = arith.constant 0 : i32
    %c0_i32_1 = arith.constant 0 : i32
    return %c0_i32, %c0_i32_0 : i32, i32
  }
  func.func @transform_3(%arg0: i32) -> (i32, i32) {
    %c0_i32 = arith.constant 0 : i32
    %c0_i32_0 = arith.constant 0 : i32
    %c0_i32_1 = arith.constant 0 : i32
    return %c0_i32, %c0_i32_0 : i32, i32
  }
  func.func @transform_4(%arg0: i32) -> (i32, i32) {
    %c0_i32 = arith.constant 0 : i32
    %c0_i32_0 = arith.constant 0 : i32
    %c0_i32_1 = arith.constant 0 : i32
    return %c0_i32, %c0_i32_0 : i32, i32
  }
  func.func @transform_5(%arg0: i32) -> (i32, i32) {
    %c0_i32 = arith.constant 0 : i32
    %c0_i32_0 = arith.constant 0 : i32
    %c0_i32_1 = arith.constant 0 : i32
    return %c0_i32, %c0_i32_0 : i32, i32
  }
  func.func @transform_6(%arg0: i32) -> (i32, i32) {
    %c0_i32 = arith.constant 0 : i32
    %c0_i32_0 = arith.constant 0 : i32
    %c0_i32_1 = arith.constant 0 : i32
    return %c0_i32, %c0_i32_0 : i32, i32
  }
  func.func @transform_7(%arg0: i32) -> (i32, i32) {
    %c0_i32 = arith.constant 0 : i32
    %c0_i32_0 = arith.constant 0 : i32
    %c0_i32_1 = arith.constant 0 : i32
    return %c0_i32, %c0_i32_0 : i32, i32
  }
  func.func @transform_8(%arg0: i32) -> (i32, i32) {
    %c0_i32 = arith.constant 0 : i32
    %c0_i32_0 = arith.constant 0 : i32
    %c0_i32_1 = arith.constant 0 : i32
    return %c0_i32, %c0_i32_0 : i32, i32
  }
  func.func @transform_9(%arg0: i32) -> (i32, i32) {
    %c0_i32 = arith.constant 0 : i32
    %c0_i32_0 = arith.constant 0 : i32
    %c0_i32_1 = arith.constant 0 : i32
    return %c0_i32, %c0_i32_0 : i32, i32
  }
  func.func @transform_10(%arg0: i32) -> (i32, i32) {
    %c0_i32 = arith.constant 0 : i32
    %c0_i32_0 = arith.constant 0 : i32
    %c0_i32_1 = arith.constant 0 : i32
    return %c0_i32, %c0_i32_0 : i32, i32
  }
  func.func @transform_11(%arg0: i32) -> (i32, i32) {
    %c0_i32 = arith.constant 0 : i32
    %c0_i32_0 = arith.constant 0 : i32
    return %arg0, %c0_i32 : i32, i32
  }
}

</mosaic_0001>

<bundles_post_ra>
// kernel: tpu_custom_call.1
= control target key start
LH: loop header
LB: loop body
LE: loop exit
PB: predicated region body
PF: predicated region fallthrough
CT: control target
= control target key end

     0   :  { %16 = vsyncpa [#allocation3], 0  ;;  %s1342_s0 = inlined_call_operand.vmem [shape: f32[8,16], index: 0, kind: input, shape index: {}]   ;;  %s1343_s1 = inlined_call_operand.vmem [shape: f32[8,8], index: 1, kind: input, shape index: {}]   ;;  %s1344_s2 = inlined_call_operand.vmem [shape: bf16[16,256], index: 2, kind: input, shape index: {}]   ;;  %s1345_s3 = inlined_call_operand.vmem [shape: bf16[8,256], index: 3, kind: input, shape index: {}]   ;;  %s1346_s4 = inlined_call_operand.vmem [shape: f32[1,256], index: 4, kind: input, shape index: {}]   ;;  %s1347_s5 = inlined_call_operand.hbm [shape: bf16[256,256], index: 5, kind: input, shape index: {}]   ;;  %s1348_s6 = inlined_call_operand.vmem [shape: f32[1,256], index: 6, kind: input, shape index: {}]   ;;  %s1349_s7 = inlined_call_operand.hbm [shape: bf16[256,256], index: 7, kind: input, shape index: {}]   ;;  %s1350_s8 = inlined_call_operand.vmem [shape: f32[1,256], index: 8, kind: input, shape index: {}]   ;;  %s1351_s9 = inlined_call_operand.vmem [shape: bf16[256,4], index: 9, kind: input, shape index: {}]   ;;  %s1352_s10 = inlined_call_operand.vmem [shape: f32[1,4], index: 10, kind: input, shape index: {}]   ;;  %s1353_s11 = inlined_call_operand.vmem [shape: f32[8,4], index: 11, kind: output, shape index: {}]  }
   0x1   :  { %17 = vsyncpa [#allocation5], 0  ;;  %s1165_s17 = smov [#allocation2]   ;;  %s1117_s21 = scalar_lea.hbm %s1347_s5, 4096 }
   0x2   :  { %s33_s18 = sshll.u32 %s1165_s17, 4  ;;  %p1118_p0 = scmp.ne.s32.totalorder %s1347_s5, %s1117_s21  ;;  %s34_s18 = int_to_ptr.vmem [resolvable:$true] %s33_s18 }
   0x3   :  { %p1121_p1 = scmp.lt.u32.totalorder %s1117_s21, %s1347_s5 }
   0x5   :  { %p1123_p2 = pnand %p1121_p1, %p1118_p0 }
   0x7   :  { %1126 = shalt.err (!%p1123_p2)
}
   0x8   :  { %s1127_s26 = scalar_lea.vmem %s34_s18, 4096  ;;  %p1132_p4 = scmp.lt.s32.totalorder %s34_s18, %s34_s18 }
   0x9   :  { %p1128_p3 = scmp.ne.s32.totalorder %s34_s18, %s1127_s26  ;;  %p1133_p5 = scmp.lt.s32.totalorder %s1127_s26, %s1127_s26 }
   0xb   :  { %p1134_p6 = por %p1133_p5, %p1132_p4 }
   0xd   :  { %p1135_p7 = pnand %p1134_p6, %p1128_p3 }
   0xf   :  { %1138 = shalt.err (!%p1135_p7)
}
  0x10   :  { %s1166_s27 = smov 128   ;;  %s1167_s28 = smov 8  }
  0x11   :  { %39 = dma.hbm_to_vmem [thread:$0]  %s1347_s5, 4096, %s34_s18, [#allocation3], %s1166_s27, %s1166_s27, %s1167_s28  }
  0x12   :  { %s1168_s12 = smov [#allocation4]   ;;  %s1139_s16 = scalar_lea.hbm %s1349_s7, 4096 }
  0x13   :  { %s47_s13 = sshll.u32 %s1168_s12, 4  ;;  %p1140_p8 = scmp.ne.s32.totalorder %s1349_s7, %s1139_s16  ;;  %s48_s13 = int_to_ptr.vmem [resolvable:$true] %s47_s13 }
  0x14   :  { %p1143_p9 = scmp.lt.u32.totalorder %s1139_s16, %s1349_s7 }
  0x16   :  { %p1145_p10 = pnand %p1143_p9, %p1140_p8 }
  0x18   :  { %1148 = shalt.err (!%p1145_p10)
}
  0x19   :  { %s1149_s22 = scalar_lea.vmem %s48_s13, 4096  ;;  %p1154_p12 = scmp.lt.s32.totalorder %s48_s13, %s48_s13 }
  0x1a   :  { %p1150_p11 = scmp.ne.s32.totalorder %s48_s13, %s1149_s22  ;;  %p1155_p13 = scmp.lt.s32.totalorder %s1149_s22, %s1149_s22 }
  0x1c   :  { %p1156_p0 = por %p1155_p13, %p1154_p12 }
  0x1e   :  { %p1157_p1 = pnand %p1156_p0, %p1150_p11 }
  0x20   :  { %1160 = shalt.err (!%p1157_p1)
}
  0x21   :  { %53 = dma.hbm_to_vmem [thread:$0]  %s1349_s7, 4096, %s48_s13, [#allocation5], %s1166_s27, %s1166_s27, %s1167_s28  }
  0x22   :  { %1161 = dma.done.wait [#allocation3], 4096  }
  0x23   :  { %1162 = vsyncadd [#allocation3], 4294963200 }
  0x24   :  { %1163 = dma.done.wait [#allocation5], 4096  }
  0x25   :  { %1164 = vsyncadd [#allocation5], 4294963200  ;;  %v1169_v0 = vmov 0   ;;  %v73_v1 = vld [vmem:[%s1345_s3] sm:$0xff]  ;;  %vm83_vm0 = vcmask 1043456   ;;  %vm79_vm1 = vcmask 64512  }
  0x26   :  { %122 = vmatprep.mubr.bf16.mxu1 %v1169_v0  ;;  %v69_v2 = vld [vmem:[%s1343_s1] sm:$0xff]  ;;  %v886_v3 = vcombine.high %v73_v1, %v73_v1  ;;  %v885_v4 = vcombine.low %v73_v1, %v73_v1  ;;  %v1008_v11 = vld [vmem:[#allocation2 + $0x14] ss:$8 sps:$4 sm:$0xff]   ;;  %v1010_v12 = vld [vmem:[#allocation2 + $0x10] ss:$8 sps:$4 sm:$0xff]   ;;  %vm141_vm2 = vcmask 130048  }
  0x27   :  { %v1004_v5 = vld [vmem:[%s1344_s2 + $0x4] ss:$8 sps:$4 sm:$0xff]   ;;  %v70_v7 = vpack.c.bf16 %v69_v2, %v69_v2  ;;  %v1007_v9 = vld [vmem:[#allocation2] ss:$8 sps:$4 sm:$0xff]   ;;  %v1014_v17 = vld [vmem:[#allocation2 + $0x34] ss:$8 sps:$4 sm:$0xff]  }
  0x28   :  { %887 = vmatprep.subr.msk.bf16.mxu1 %vm83_vm0, %v886_v3  ;;  %v85_v6 = vsel %vm83_vm0, %v885_v4, 0  ;;  %v1005_v8 = vld [vmem:[#allocation2 + $0x4] ss:$8 sps:$4 sm:$0xff]   ;;  %v1002_v10 = vld [vmem:[%s1344_s2] ss:$8 sps:$4 sm:$0xff]   ;;  %vm877_vm3 = vcmask 31744  }
  0x29   :  { %91 = vmatpush1.bf16.msra.mxu1 %v85_v6  ;;  %408 = vmatprep.subr.bf16.mxu0 %v1005_v8  ;;  %v1011_v13 = vld [vmem:[#allocation2 + $0x24] ss:$8 sps:$4 sm:$0xff]   ;;  %v1013_v15 = vld [vmem:[#allocation2 + $0x20] ss:$8 sps:$4 sm:$0xff]   ;;  %v1016_v18 = vld [vmem:[#allocation2 + $0x30] ss:$8 sps:$4 sm:$0xff]  }
  0x2a   :  { %145 = vmatprep.subr.bf16.mxu1 %v1004_v5  ;;  %409 = vmatpush1.bf16.msra.mxu0 %v1007_v9  ;;  %v67_v14 = vld [vmem:[%s1342_s0] sm:$0xff]  ;;  %v1020_v21 = vld [vmem:[#allocation2 + $0x54] ss:$8 sps:$4 sm:$0xff]   ;;  %v1022_v22 = vld [vmem:[#allocation2 + $0x50] ss:$8 sps:$4 sm:$0xff]  }
  0x2b   :  { %410 = vmatprep.subr.bf16.mxu0 %v1008_v11  ;;  %v68_v16 = vpack.c.bf16 %v67_v14, %v67_v14  ;;  %v1017_v19 = vld [vmem:[#allocation2 + $0x44] ss:$8 sps:$4 sm:$0xff]   ;;  %v1019_v20 = vld [vmem:[#allocation2 + $0x40] ss:$8 sps:$4 sm:$0xff]   ;;  %v1026_v25 = vld [vmem:[#allocation2 + $0x74] ss:$8 sps:$4 sm:$0xff]  }
  0x2c   :  { %888 = vmatmul.mubr.msk.bf16.vlgmr.msra.gmra.mrb[0].mxu1 %vm79_vm1, %v70_v7  ;;  %v1023_v23 = vld [vmem:[#allocation2 + $0x64] ss:$8 sps:$4 sm:$0xff]   ;;  %v1025_v24 = vld [vmem:[#allocation2 + $0x60] ss:$8 sps:$4 sm:$0xff]   ;;  %v1028_v26 = vld [vmem:[#allocation2 + $0x70] ss:$8 sps:$4 sm:$0xff]   ;;  %v188_v7 = vlaneseq }
  0x2d   :  { %146 = vmatpush1.bf16.msra.mxu1 %v1002_v10  ;;  %177 = vmatprep.mubr.bf16.mxu1 %v1169_v0  ;;  %v1029_v27 = vld [vmem:[#allocation2 + $0x84] ss:$8 sps:$4 sm:$0xff]   ;;  %v1031_v28 = vld [vmem:[#allocation2 + $0x80] ss:$8 sps:$4 sm:$0xff]   ;;  %v1032_v29 = vld [vmem:[#allocation2 + $0x94] ss:$8 sps:$4 sm:$0xff]  }
  0x2e   :  { %411 = vmatpush1.bf16.msra.mxu0 %v1010_v12  ;;  %v1034_v30 = vld [vmem:[#allocation2 + $0x90] ss:$8 sps:$4 sm:$0xff]   ;;  %v1035_v31 = vld [vmem:[#allocation2 + $0xa4] ss:$8 sps:$4 sm:$0xff]   ;;  %v1037_v32 = vld [vmem:[#allocation2 + $0xa0] ss:$8 sps:$4 sm:$0xff]  }
  0x2f   :  { %412 = vmatprep.subr.bf16.mxu0 %v1011_v13  ;;  %v1038_v33 = vld [vmem:[#allocation2 + $0xb4] ss:$8 sps:$4 sm:$0xff]   ;;  %v1040_v34 = vld [vmem:[#allocation2 + $0xb0] ss:$8 sps:$4 sm:$0xff]   ;;  %v1041_v35 = vld [vmem:[#allocation2 + $0xc4] ss:$8 sps:$4 sm:$0xff]  }
  0x30   :  { %v1043_v36 = vld [vmem:[#allocation2 + $0xc0] ss:$8 sps:$4 sm:$0xff]   ;;  %v1044_v37 = vld [vmem:[#allocation2 + $0xd4] ss:$8 sps:$4 sm:$0xff]   ;;  %v1046_v38 = vld [vmem:[#allocation2 + $0xd0] ss:$8 sps:$4 sm:$0xff]  }
  0x31   :  { %v1047_v39 = vld [vmem:[#allocation2 + $0xe4] ss:$8 sps:$4 sm:$0xff]   ;;  %v1049_v40 = vld [vmem:[#allocation2 + $0xe0] ss:$8 sps:$4 sm:$0xff]   ;;  %v1050_v41 = vld [vmem:[#allocation2 + $0xf4] ss:$8 sps:$4 sm:$0xff]  }
  0x32   :  { %413 = vmatpush1.bf16.msra.mxu0 %v1013_v15  ;;  %v1052_v42 = vld [vmem:[#allocation2 + $0xf0] ss:$8 sps:$4 sm:$0xff]   ;;  %v1053_v43 = vld [vmem:[#allocation4] ss:$8 sps:$4 sm:$0xff]   ;;  %v1055_v44 = vld [vmem:[#allocation4 + $0x4] ss:$8 sps:$4 sm:$0xff]  }
  0x33   :  { %414 = vmatprep.subr.bf16.mxu0 %v1014_v17  ;;  %v1058_v45 = vld [vmem:[#allocation4 + $0x14] ss:$8 sps:$4 sm:$0xff]   ;;  %657 = vmatprep.subr.bf16.mxu1 %v1055_v44  ;;  %v1056_v46 = vld [vmem:[#allocation4 + $0x10] ss:$8 sps:$4 sm:$0xff]   ;;  %v1061_v47 = vld [vmem:[#allocation4 + $0x24] ss:$8 sps:$4 sm:$0xff]  }
  0x34   :  { %891 = vmatmul.mubr.msk.bf16.vlgmr.msra.gmra.mrb[4].mxu1 %vm141_vm2, %v68_v16  ;;  %v1059_v48 = vld [vmem:[#allocation4 + $0x20] ss:$8 sps:$4 sm:$0xff]   ;;  %v1064_v49 = vld [vmem:[#allocation4 + $0x34] ss:$8 sps:$4 sm:$0xff]   ;;  %v1062_v50 = vld [vmem:[#allocation4 + $0x30] ss:$8 sps:$4 sm:$0xff]  }
  0x35   :  { %658 = vmatpush1.bf16.msra.mxu1 %v1053_v43  ;;  %v1067_v51 = vld [vmem:[#allocation4 + $0x44] ss:$8 sps:$4 sm:$0xff]   ;;  %v1065_v52 = vld [vmem:[#allocation4 + $0x40] ss:$8 sps:$4 sm:$0xff]   ;;  %v1070_v53 = vld [vmem:[#allocation4 + $0x54] ss:$8 sps:$4 sm:$0xff]  }
  0x36   :  { %415 = vmatpush1.bf16.msra.mxu0 %v1016_v18  ;;  %659 = vmatprep.subr.bf16.mxu1 %v1058_v45  ;;  %v1068_v54 = vld [vmem:[#allocation4 + $0x50] ss:$8 sps:$4 sm:$0xff]   ;;  %v1073_v55 = vld [vmem:[#allocation4 + $0x64] ss:$8 sps:$4 sm:$0xff]   ;;  %v1071_v56 = vld [vmem:[#allocation4 + $0x60] ss:$8 sps:$4 sm:$0xff]  }
  0x37   :  { %416 = vmatprep.subr.bf16.mxu0 %v1017_v19  ;;  %v1076_v57 = vld [vmem:[#allocation4 + $0x74] ss:$8 sps:$4 sm:$0xff]   ;;  %v1074_v58 = vld [vmem:[#allocation4 + $0x70] ss:$8 sps:$4 sm:$0xff]   ;;  %v1079_v59 = vld [vmem:[#allocation4 + $0x84] ss:$8 sps:$4 sm:$0xff]  }
  0x38   :  { %v1077_v60 = vld [vmem:[#allocation4 + $0x80] ss:$8 sps:$4 sm:$0xff]   ;;  %v1082_v61 = vld [vmem:[#allocation4 + $0x94] ss:$8 sps:$4 sm:$0xff]   ;;  %v1080_v62 = vld [vmem:[#allocation4 + $0x90] ss:$8 sps:$4 sm:$0xff]  }
  0x39   :  { %660 = vmatpush1.bf16.msra.mxu1 %v1056_v46  ;;  %v1085_v63 = vld [vmem:[#allocation4 + $0xa4] ss:$8 sps:$4 sm:$0xff]   ;;  %v1083_v0 = vld [vmem:[#allocation4 + $0xa0] ss:$8 sps:$4 sm:$0xff]   ;;  %v1088_v1 = vld [vmem:[#allocation4 + $0xb4] ss:$8 sps:$4 sm:$0xff]  }
  0x3a   :  { %417 = vmatpush1.bf16.msra.mxu0 %v1019_v20  ;;  %661 = vmatprep.subr.bf16.mxu1 %v1061_v47  ;;  %v1086_v2 = vld [vmem:[#allocation4 + $0xb0] ss:$8 sps:$4 sm:$0xff]   ;;  %v1091_v3 = vld [vmem:[#allocation4 + $0xc4] ss:$8 sps:$4 sm:$0xff]   ;;  %v1089_v4 = vld [vmem:[#allocation4 + $0xc0] ss:$8 sps:$4 sm:$0xff]  }
  0x3b   :  { %418 = vmatprep.subr.bf16.mxu0 %v1020_v21  ;;  %v1094_v5 = vld [vmem:[#allocation4 + $0xd4] ss:$8 sps:$4 sm:$0xff]   ;;  %v1092_v6 = vld [vmem:[#allocation4 + $0xd0] ss:$8 sps:$4 sm:$0xff]   ;;  %v189_v8 = vshrl.u32 %v188_v7, 7  ;;  %v1110_v43 = vld [vmem:[%s1351_s9 + $0x20] sm:$0xff]  }
  0x3c   :  { %v186_v14 = vld [vmem:[%s1346_s4] sm:$0x3]  ;;  %v1111_v44 = vld [vmem:[%s1351_s9 + $0x68] sm:$0xff]  }
  0x3d   :  { %662 = vmatpush1.bf16.msra.mxu1 %v1059_v48  ;;  %v1269_v13 = vsub.s32 0, %v189_v8  ;;  %v1274_v15 = vsub.s32 1, %v189_v8  ;;  %v1112_v45 = vld [vmem:[%s1351_s9 + $0x28] sm:$0xff]   ;;  %v236_v46 = vld [vmem:[%s1348_s6] sm:$0x3] }
  0x3e   :  { %419 = vmatpush1.bf16.msra.mxu0 %v1022_v22  ;;  %663 = vmatprep.subr.bf16.mxu1 %v1064_v49 }
  0x3f   :  { %420 = vmatprep.subr.bf16.mxu0 %v1023_v23  ;;  %v191_v16 = vrot.slane %v186_v14, %v1269_v13  ;;  %v195_v18 = vrot.slane %v186_v14, %v1274_v15  ;;  %v241_v47 = vrot.slane %v236_v46, %v1269_v13  ;;  %v245_v48 = vrot.slane %v236_v46, %v1274_v15  ;;  %v956_v14 = vld [vmem:[%s1352_s10] ss:$0 sm:$0xff] }
  0x41   :  { %664 = vmatpush1.bf16.msra.mxu1 %v1062_v50 }
  0x42   :  { %421 = vmatpush1.bf16.msra.mxu0 %v1025_v24  ;;  %665 = vmatprep.subr.bf16.mxu1 %v1067_v51 }
  0x43   :  { %422 = vmatprep.subr.bf16.mxu0 %v1026_v25 }
  0x45   :  { %666 = vmatpush1.bf16.msra.mxu1 %v1065_v52 }
  0x46   :  { %423 = vmatpush1.bf16.msra.mxu0 %v1028_v26  ;;  %667 = vmatprep.subr.bf16.mxu1 %v1070_v53 }
  0x47   :  { %424 = vmatprep.subr.bf16.mxu0 %v1029_v27 }
  0x49   :  { %668 = vmatpush1.bf16.msra.mxu1 %v1068_v54 }
  0x4a   :  { %425 = vmatpush1.bf16.msra.mxu0 %v1031_v28  ;;  %669 = vmatprep.subr.bf16.mxu1 %v1073_v55 }
  0x4b   :  { %426 = vmatprep.subr.bf16.mxu0 %v1032_v29 }
  0x4d   :  { %670 = vmatpush1.bf16.msra.mxu1 %v1071_v56 }
  0x4e   :  { %427 = vmatpush1.bf16.msra.mxu0 %v1034_v30  ;;  %671 = vmatprep.subr.bf16.mxu1 %v1076_v57  ;;  %v1097_v30 = vld [vmem:[#allocation4 + $0xe4] ss:$8 sps:$4 sm:$0xff]  }
  0x4f   :  { %428 = vmatprep.subr.bf16.mxu0 %v1035_v31  ;;  %v1095_v31 = vld [vmem:[#allocation4 + $0xe0] ss:$8 sps:$4 sm:$0xff]  }
  0x51   :  { %672 = vmatpush1.bf16.msra.mxu1 %v1074_v58 }
  0x52   :  { %429 = vmatpush1.bf16.msra.mxu0 %v1037_v32  ;;  %673 = vmatprep.subr.bf16.mxu1 %v1079_v59  ;;  %v1100_v32 = vld [vmem:[#allocation4 + $0xf4] ss:$8 sps:$4 sm:$0xff]  }
  0x53   :  { %430 = vmatprep.subr.bf16.mxu0 %v1038_v33  ;;  %v1098_v33 = vld [vmem:[#allocation4 + $0xf0] ss:$8 sps:$4 sm:$0xff]  }
  0x54   :  { %v1113_v59 = vld [vmem:[%s1351_s9 + $0x70] sm:$0xff]  }
  0x55   :  { %674 = vmatpush1.bf16.msra.mxu1 %v1077_v60  ;;  %v1114_v60 = vld [vmem:[%s1351_s9 + $0x30] sm:$0xff]  }
  0x56   :  { %431 = vmatpush1.bf16.msra.mxu0 %v1040_v34  ;;  %675 = vmatprep.subr.bf16.mxu1 %v1082_v61  ;;  %v1101_v34 = vld [vmem:[%s1351_s9 + $0x40] sm:$0xff]   ;;  %v1115_v61 = vld [vmem:[%s1351_s9 + $0x78] sm:$0xff]  }
  0x57   :  { %432 = vmatprep.subr.bf16.mxu0 %v1041_v35  ;;  %v1102_v35 = vld [vmem:[%s1351_s9] sm:$0xff]  }
  0x59   :  { %676 = vmatpush1.bf16.msra.mxu1 %v1080_v62  ;;  %v1116_v62 = vld [vmem:[%s1351_s9 + $0x38] sm:$0xff]  }
  0x5a   :  { %433 = vmatpush1.bf16.msra.mxu0 %v1043_v36  ;;  %677 = vmatprep.subr.bf16.mxu1 %v1085_v63  ;;  %v1103_v36 = vld [vmem:[%s1351_s9 + $0x48] sm:$0xff]   ;;  %v485_v63 = vld [vmem:[%s1350_s8] sm:$0x3] }
  0x5b   :  { %434 = vmatprep.subr.bf16.mxu0 %v1044_v37  ;;  %v1104_v37 = vld [vmem:[%s1351_s9 + $0x8] sm:$0xff]  }
  0x5d   :  { %678 = vmatpush1.bf16.msra.mxu1 %v1083_v0  ;;  %v490_v0 = vrot.slane %v485_v63, %v1269_v13 }
  0x5e   :  { %435 = vmatpush1.bf16.msra.mxu0 %v1046_v38  ;;  %679 = vmatprep.subr.bf16.mxu1 %v1088_v1  ;;  %v1105_v38 = vld [vmem:[%s1351_s9 + $0x50] sm:$0xff]   ;;  %v494_v1 = vrot.slane %v485_v63, %v1274_v15 }
  0x5f   :  { %436 = vmatprep.subr.bf16.mxu0 %v1047_v39  ;;  %v1106_v39 = vld [vmem:[%s1351_s9 + $0x10] sm:$0xff]  }
  0x61   :  { %680 = vmatpush1.bf16.msra.mxu1 %v1086_v2 }
  0x62   :  { %437 = vmatpush1.bf16.msra.mxu0 %v1049_v40  ;;  %681 = vmatprep.subr.bf16.mxu1 %v1091_v3  ;;  %v1107_v40 = vld [vmem:[%s1351_s9 + $0x58] sm:$0xff]  }
  0x63   :  { %438 = vmatprep.subr.bf16.mxu0 %v1050_v41  ;;  %v1108_v41 = vld [vmem:[%s1351_s9 + $0x18] sm:$0xff]  }
  0x65   :  { %682 = vmatpush1.bf16.msra.mxu1 %v1089_v4 }
  0x66   :  { %439 = vmatpush1.bf16.msra.mxu0 %v1052_v42  ;;  %683 = vmatprep.subr.bf16.mxu1 %v1094_v5  ;;  %v1109_v42 = vld [vmem:[%s1351_s9 + $0x60] sm:$0xff]  }
  0x67   :  { %973 = vmatprep.subr.bf16.mxu0 %v1101_v34 }
  0x69   :  { %684 = vmatpush1.bf16.msra.mxu1 %v1092_v6 }
  0x6a   :  { %685 = vmatprep.subr.bf16.mxu1 %v1097_v30 }
  0x6d   :  { %686 = vmatpush1.bf16.msra.mxu1 %v1095_v31 }
  0x6e   :  { %687 = vmatprep.subr.bf16.mxu1 %v1100_v32 }
  0x71   :  { %688 = vmatpush1.bf16.msra.mxu1 %v1098_v33 }
  0xff   :  { %v124_v9 = vpop.f32.mrb[0].mxu1 }
 0x100   :  { %v126_v10 = vpop.f32.mrb[1].mxu1 }
 0x101   :  { %v128_v11 = vpop.f32.mrb[2].mxu1 }
 0x102   :  { %v129_v12 = vpop.f32.mrb[3].mxu1 }
 0x107   :  { %v179_v17 = vpop.f32.mrb[4].mxu1 }
 0x108   :  { %v180_v19 = vadd.f32 %v179_v17, %v124_v9  ;;  %v181_v20 = vpop.f32.mrb[5].mxu1 }
 0x109   :  { %v182_v21 = vadd.f32 %v181_v20, %v126_v10  ;;  %v183_v22 = vpop.f32.mrb[6].mxu1 }
 0x10a   :  { %v198_v23 = vadd.f32 %v191_v16, %v180_v19  ;;  %v184_v24 = vpop.f32.mrb[7].mxu1 }
 0x10b   :  { %v199_v25 = vadd.f32 %v195_v18, %v182_v21 }
 0x10c   :  { %v200_v26 = vmax.f32 %v198_v23, 0.0 }
 0x10d   :  { %v201_v27 = vmax.f32 %v199_v25, 0.0 }
 0x10e   :  { %v202_v29 = vpack.c.bf16 %v200_v26, %v200_v26 }
 0x10f   :  { %v203_v28 = vpack.c.bf16 %v201_v27, %v201_v27 }
 0x111   :  { %440 = vmatprep.mubr.bf16.mxu0 %v203_v28 }
 0x112   :  { %441 = vmatmul.mubr.bf16.vlgmr.msra.gmra.mrb[0].mxu0 %v202_v29 }
 0x113   :  { %974 = vmatpush3.bf16.msra.mxu0 %v1102_v35 }
 0x114   :  { %975 = vmatprep.subr.bf16.mxu0 %v1103_v36 }
 0x117   :  { %976 = vmatpush3.bf16.msra.mxu0 %v1104_v37 }
 0x118   :  { %977 = vmatprep.subr.bf16.mxu0 %v1105_v38 }
 0x11b   :  { %978 = vmatpush3.bf16.msra.mxu0 %v1106_v39 }
 0x11c   :  { %979 = vmatprep.subr.bf16.mxu0 %v1107_v40 }
 0x11f   :  { %980 = vmatpush3.bf16.msra.mxu0 %v1108_v41 }
 0x120   :  { %981 = vmatprep.subr.bf16.mxu0 %v1109_v42 }
 0x123   :  { %982 = vmatpush3.bf16.msra.mxu0 %v1110_v43 }
 0x124   :  { %983 = vmatprep.subr.bf16.mxu0 %v1111_v44 }
 0x127   :  { %984 = vmatpush3.bf16.msra.mxu0 %v1112_v45 }
 0x128   :  { %985 = vmatprep.subr.bf16.mxu0 %v1113_v59 }
 0x12b   :  { %986 = vmatpush3.bf16.msra.mxu0 %v1114_v60 }
 0x12c   :  { %987 = vmatprep.subr.bf16.mxu0 %v1115_v61 }
 0x12f   :  { %988 = vmatpush3.bf16.msra.mxu0 %v1116_v62 }
 0x1e5   :  { %v442_v49 = vpop.f32.mrb[0].mxu0 }
 0x1e6   :  { %v443_v50 = vadd.f32 %v442_v49, %v241_v47  ;;  %v444_v51 = vpop.f32.mrb[1].mxu0 }
 0x1e7   :  { %v445_v52 = vadd.f32 %v444_v51, %v245_v48  ;;  %v446_v53 = vpop.f32.mrb[2].mxu0 }
 0x1e8   :  { %v449_v54 = vmax.f32 %v443_v50, 0.0  ;;  %v447_v55 = vpop.f32.mrb[3].mxu0 }
 0x1e9   :  { %v450_v56 = vmax.f32 %v445_v52, 0.0 }
 0x1ea   :  { %v451_v58 = vpack.c.bf16 %v449_v54, %v449_v54 }
 0x1eb   :  { %v452_v57 = vpack.c.bf16 %v450_v56, %v450_v56 }
 0x1ed   :  { %689 = vmatprep.mubr.bf16.mxu1 %v452_v57 }
 0x1ee   :  { %690 = vmatmul.mubr.bf16.vlgmr.msra.gmra.mrb[8].mxu1 %v451_v58 }
 0x2c1   :  { %v691_v2 = vpop.f32.mrb[8].mxu1 }
 0x2c2   :  { %v692_v3 = vadd.f32 %v691_v2, %v490_v0  ;;  %v693_v4 = vpop.f32.mrb[9].mxu1 }
 0x2c3   :  { %v694_v5 = vadd.f32 %v693_v4, %v494_v1  ;;  %v695_v6 = vpop.f32.mrb[10].mxu1 }
 0x2c4   :  { %v698_v7 = vmax.f32 %v692_v3, 0.0  ;;  %v696_v8 = vpop.f32.mrb[11].mxu1 }
 0x2c5   :  { %v699_v9 = vmax.f32 %v694_v5, 0.0 }
 0x2c6   :  { %v700_v11 = vpack.c.bf16 %v698_v7, %v698_v7 }
 0x2c7   :  { %v701_v10 = vpack.c.bf16 %v699_v9, %v699_v9 }
 0x2c9   :  { %869 = vmatprep.mubr.bf16.mxu0 %v701_v10 }
 0x2ca   :  { %870 = vmatmul.mubr.bf16.vlgmr.msra.gmra.mrb[4].mxu0 %v700_v11 }
 0x39d   :  { %v989_v12 = vpop.f32.mrb[4].mxu0 }
 0x39e   :  { %v990_v13 = vpop.f32.mrb[5].mxu0 }
 0x39f   :  { %v991_v16 = vadd.f32 %v990_v13, %v989_v12  ;;  %v992_v15 = vpop.f32.mrb[6].mxu0 }
 0x3a0   :  { %v993_v17 = vpop.f32.mrb[7].mxu0 }
 0x3a1   :  { %v872_v18 = vadd.f32 %v991_v16, %v956_v14 }
 0x3a3   :  { %878 = vst.msk [vmem:[%s1353_s11] sm:$0xff] %vm877_vm3, %v872_v18 }
 0x3a4   :  { %883 = vsyncpa [#allocation3], 1 }
 0x3a5   :  { %884 = vsyncpa [#allocation5], 1 }

</bundles_post_ra>
